<compile_context>
chip_gen: v7x
topology: tpu7x:2x2x1
jax: 0.10.0
libtpu: 0.0.40
codegen_flags: <defaults>
</compile_context>

<pallas_src>
import functools

import jax
import jax.numpy as jnp
from jax.experimental import pallas as pl
from jax.experimental.pallas import tpu as pltpu


def _round_up(x, m):
    return (x + m - 1) // m * m


def _vmem_limit(nbytes):
    # Generous scoped-VMEM budget: 2x the static estimate, floored at 32 MiB.
    # A large *limit* is harmless (allocation is what must fit physical VMEM);
    # v7x users with NP >~ 2500 should tile the encoder too (see TODO below).
    return int(min(max(2 * nbytes, 32 * 1024 * 1024), 100 * 1024 * 1024))


# ------------------------------ encoder kernel ------------------------------ #
def _gin_encoder_kernel(adj_ref, x_ref, inv_deg_ref, w1_ref, b1_ref, w2_ref,
                        b2_ref, z_ref, zt_ref, *, eps):
    """Two fused GINConv layers; whole (padded) graph in one block.

    Zero padding cannot contaminate real rows: padded adjacency entries are 0,
    padded inv_deg is 0, and the decoder output is sliced back to (N, N).
    """
    adj = adj_ref[...]                                    # (NP, NP) bf16, exact 0/1
    x = x_ref[...]                                        # (NP, DP) f32

    # ---- layer 0: mean aggregation + Linear + ReLU --------------------------
    agg0 = jnp.dot(adj, x.astype(jnp.bfloat16),           # MXU, f32 accumulate
                   preferred_element_type=jnp.float32)
    h = (1.0 + eps) * x + agg0 * inv_deg_ref[...]         # (NP,1) f32, exact 1/deg
    h = jnp.dot(h.astype(jnp.bfloat16), w1_ref[...],      # weights already bf16
                preferred_element_type=jnp.float32) + b1_ref[...]
    h = jnp.maximum(h, 0.0)                               # ReLU

    # nn.Dropout in eval mode -> identity (inference forward pass).

    # ---- layer 1: sum aggregation + Linear + ReLU ----------------------------
    agg1 = jnp.dot(adj, h.astype(jnp.bfloat16), preferred_element_type=jnp.float32)
    z = (1.0 + eps) * h + agg1
    z = jnp.dot(z.astype(jnp.bfloat16), w2_ref[...],
                preferred_element_type=jnp.float32) + b2_ref[...]
    z = jnp.maximum(z, 0.0)                               # ReLU

    z_ref[...] = z.astype(jnp.bfloat16)                   # (NP, H2P) decoder LHS
    zt_ref[...] = z.T.astype(jnp.bfloat16)                # (H2P, NP), one XLU transpose


# ------------------------------ decoder kernel ------------------------------ #
def _gin_decoder_kernel(z_ref, zt_ref, out_ref):
    """One output-row tile of sigmoid(z @ z^T): (TM,H2P)@(H2P,NP) on the MXU."""
    logits = jnp.dot(z_ref[...], zt_ref[...], preferred_element_type=jnp.float32)
    out_ref[...] = jax.nn.sigmoid(logits).astype(out_ref.dtype)   # lane-dense bf16


# --------------------------------- wrapper ---------------------------------- #
@functools.partial(jax.jit, static_argnames=("eps",))
def gin_forward(adj, features, params, eps=0.0):
    """Full GIN forward. adj: (N, N) 0/1 float, features: (N, in_dim) f32.

    Returns sigmoid(z @ z^T) as bf16 (halves the dominant NP^2 HBM writeback);
    cast in the consumer if f32 probabilities are required.
    """
    n = adj.shape[0]
    in_dim = features.shape[1]
    h1 = params["w1"].shape[1]
    h2 = params["w2"].shape[1]

    # pad everything to lane-dense multiples of 128 (unmasked vector stores)
    np_ = max(_round_up(n, 128), 128)
    dp = max(_round_up(in_dim, 128), 128)
    h1p = max(_round_up(h1, 128), 128)
    h2p = max(_round_up(h2, 128), 128)

    # --- wrapper-side prep: cast BEFORE padding (one HBM pass per array) ------
    adj_p = jnp.pad(adj.astype(jnp.bfloat16), ((0, np_ - n), (0, np_ - n)))   # exact 0/1
    x_p = jnp.pad(features.astype(jnp.float32), ((0, np_ - n), (0, dp - in_dim)))
    w1_p = jnp.pad(params["w1"].astype(jnp.bfloat16), ((0, dp - in_dim), (0, h1p - h1)))
    b1_p = jnp.pad(params["b1"].reshape(1, -1).astype(jnp.float32), ((0, 0), (0, h1p - h1)))
    w2_p = jnp.pad(params["w2"].astype(jnp.bfloat16), ((0, h1p - h1), (0, h2p - h2)))
    b2_p = jnp.pad(params["b2"].reshape(1, -1).astype(jnp.float32), ((0, 0), (0, h2p - h2)))

    # exact mean normalization, off the MXU; XLA fuses this with the adj pad/cast pass
    deg = jnp.sum(adj.astype(jnp.float32), axis=1, keepdims=True)              # (n, 1)
    inv_deg = jnp.where(deg > 0.0, 1.0 / jnp.maximum(deg, 1.0), 0.0)
    inv_deg_p = jnp.pad(inv_deg, ((0, np_ - n), (0, 0)))                       # (NP, 1)

    # ------------------- stage 1: fused encoder -> z, z^T ---------------------
    # TODO(synk): for very large graphs (NP >~ 2500 on v7x's 64 MiB VMEM) also tile
    # the encoder aggregations over a k-reduction ("arbitrary") axis with a VMEM
    # accumulator; at whole-graph-in-VMEM sizes a single fused block is optimal.
    enc_bytes = (2 * np_ * np_ + 4 * np_ * dp + 4 * np_
                 + 2 * dp * h1p + 2 * h1p * h2p + 4 * (h1p + h2p)
                 + 4 * np_ * (dp + h1p + h2p) + 4 * np_ * h2p)
    z_p, zt_p = pl.pallas_call(
        functools.partial(_gin_encoder_kernel, eps=eps),
        out_shape=(jax.ShapeDtypeStruct((np_, h2p), jnp.bfloat16),
                   jax.ShapeDtypeStruct((h2p, np_), jnp.bfloat16)),
        in_specs=[
            pl.BlockSpec((np_, np_), lambda: (0, 0)),
            pl.BlockSpec((np_, dp), lambda: (0, 0)),
            pl.BlockSpec((np_, 1), lambda: (0, 0)),
            pl.BlockSpec((dp, h1p), lambda: (0, 0)),
            pl.BlockSpec((1, h1p), lambda: (0, 0)),
            pl.BlockSpec((h1p, h2p), lambda: (0, 0)),
            pl.BlockSpec((1, h2p), lambda: (0, 0)),
        ],
        out_specs=(pl.BlockSpec((np_, h2p), lambda: (0, 0)),
                   pl.BlockSpec((h2p, np_), lambda: (0, 0))),
        compiler_params=pltpu.CompilerParams(vmem_limit_bytes=_vmem_limit(enc_bytes)),
    )(adj_p, x_p, inv_deg_p, w1_p, b1_p, w2_p, b2_p)

    # -------- stage 2: decoder, row-tiled + parallel grid (v7x megacore) -------
    tm = 256 if np_ % 256 == 0 else 128                  # np_ is a multiple of 128
    dec_bytes = (2 * (2 * tm * h2p)      # double-buffered z tiles (bf16)
                 + 2 * h2p * np_         # resident z^T (bf16)
                 + 2 * (2 * tm * np_)    # double-buffered output tiles (bf16)
                 + 4 * tm * np_)         # f32 logits intermediate
    out_p = pl.pallas_call(
        _gin_decoder_kernel,
        out_shape=jax.ShapeDtypeStruct((np_, np_), jnp.bfloat16),
        grid=(np_ // tm,),
        in_specs=[
            pl.BlockSpec((tm, h2p), lambda i: (i, 0)),
            pl.BlockSpec((h2p, np_), lambda i: (0, 0)),   # same block -> resident
        ],
        out_specs=pl.BlockSpec((tm, np_), lambda i: (i, 0)),
        compiler_params=pltpu.CompilerParams(
            dimension_semantics=("parallel",),
            vmem_limit_bytes=_vmem_limit(dec_bytes)),
    )(z_p, zt_p)

    # Slice back to the module's (N, N) output; at scale prefer consuming the
    # padded bf16 output directly to avoid this extra HBM pass.
    return out_p[:n, :n]


# ----------------------------------- main ----------------------------------- #
if __name__ == "__main__":
    N = 8            # number of graph nodes
    IN_DIM = 16
    HIDDEN1 = 32
    HIDDEN2 = 16

    key = jax.random.PRNGKey(0)
    k_adj, k_feat, k_w1, k_b1, k_w2, k_b2 = jax.random.split(key, 6)

    # deterministic random undirected graph (symmetric 0/1 adjacency, no self loops)
    upper = (jax.random.uniform(k_adj, (N, N)) < 0.4).astype(jnp.float32)
    upper = jnp.triu(upper, k=1)
    adj = upper + upper.T                                 # (N, N) f32

    features = jax.random.normal(k_feat, (N, IN_DIM), dtype=jnp.float32)

    # deterministic parameter init (Linear weights stored as (in, out))
    def lin_init(kw, kb, fan_in, fan_out):
        bound = 1.0 / float(jnp.sqrt(jnp.float32(fan_in)))
        w = jax.random.uniform(kw, (fan_in, fan_out), minval=-bound, maxval=bound,
                               dtype=jnp.float32)
        b = jax.random.uniform(kb, (1, fan_out), minval=-bound, maxval=bound,
                               dtype=jnp.float32)
        return w, b

    w1, b1 = lin_init(k_w1, k_b1, IN_DIM, HIDDEN1)
    w2, b2 = lin_init(k_w2, k_b2, HIDDEN1, HIDDEN2)
    params = {"w1": w1, "b1": b1, "w2": w2, "b2": b2}

    adj_rec = gin_forward(adj, features, params)
    adj_rec = jax.block_until_ready(adj_rec)
    assert adj_rec.shape == (N, N)
    assert bool(jnp.all(jnp.isfinite(adj_rec.astype(jnp.float32))))
    print("KERNEL_OK")
</pallas_src>

<mosaic_0001>
module attributes {stable_mosaic.version = 11 : i64} {
  func.func @_gin_encoder_kernel(%arg0: memref<128x128xbf16, #tpu.memory_space<vmem>>, %arg1: memref<128x128xf32, #tpu.memory_space<vmem>>, %arg2: memref<128x1xf32, #tpu.memory_space<vmem>>, %arg3: memref<128x128xbf16, #tpu.memory_space<vmem>>, %arg4: memref<1x128xf32, #tpu.memory_space<vmem>>, %arg5: memref<128x128xbf16, #tpu.memory_space<vmem>>, %arg6: memref<1x128xf32, #tpu.memory_space<vmem>>, %arg7: memref<128x128xbf16, #tpu.memory_space<vmem>>, %arg8: memref<128x128xbf16, #tpu.memory_space<vmem>>) attributes {dimension_semantics = [], scalar_prefetch = 0 : i64, scratch_operands = 0 : i64, tpu.core_type = #tpu.core_type<tc>} {
    %c0 = arith.constant 0 : index
    %c0_0 = arith.constant 0 : index
    %0 = vector.load %arg0[%c0, %c0_0] : memref<128x128xbf16, #tpu.memory_space<vmem>>, vector<128x128xbf16>
    %c0_1 = arith.constant 0 : index
    %c0_2 = arith.constant 0 : index
    %1 = vector.load %arg1[%c0_1, %c0_2] : memref<128x128xf32, #tpu.memory_space<vmem>>, vector<128x128xf32>
    %2 = arith.truncf %1 : vector<128x128xf32> to vector<128x128xbf16>
    %cst = arith.constant dense<0.000000e+00> : vector<128x128xf32>
    %3 = tpu.matmul %0, %2, %cst {dimension_numbers = #tpu.dot_dimension_numbers<[1], [0], [0], [1], [0, 0, 1, 1], [], []>} : vector<128x128xbf16>, vector<128x128xbf16>, vector<128x128xf32> -> vector<128x128xf32>
    %cst_3 = arith.constant 1.000000e+00 : f32
    %4 = vector.broadcast %cst_3 : f32 to vector<128x128xf32>
    %5 = arith.mulf %4, %1 : vector<128x128xf32>
    %c0_4 = arith.constant 0 : index
    %c0_5 = arith.constant 0 : index
    %6 = vector.load %arg2[%c0_4, %c0_5] : memref<128x1xf32, #tpu.memory_space<vmem>>, vector<128x1xf32>
    %7 = vector.broadcast %6 : vector<128x1xf32> to vector<128x128xf32>
    %8 = arith.mulf %3, %7 : vector<128x128xf32>
    %9 = arith.addf %5, %8 : vector<128x128xf32>
    %10 = arith.truncf %9 : vector<128x128xf32> to vector<128x128xbf16>
    %c0_6 = arith.constant 0 : index
    %c0_7 = arith.constant 0 : index
    %11 = vector.load %arg3[%c0_6, %c0_7] : memref<128x128xbf16, #tpu.memory_space<vmem>>, vector<128x128xbf16>
    %cst_8 = arith.constant dense<0.000000e+00> : vector<128x128xf32>
    %12 = tpu.matmul %10, %11, %cst_8 {dimension_numbers = #tpu.dot_dimension_numbers<[1], [0], [0], [1], [0, 0, 1, 1], [], []>} : vector<128x128xbf16>, vector<128x128xbf16>, vector<128x128xf32> -> vector<128x128xf32>
    %c0_9 = arith.constant 0 : index
    %c0_10 = arith.constant 0 : index
    %13 = vector.load %arg4[%c0_9, %c0_10] : memref<1x128xf32, #tpu.memory_space<vmem>>, vector<1x128xf32>
    %14 = vector.broadcast %13 : vector<1x128xf32> to vector<128x128xf32>
    %15 = arith.addf %12, %14 : vector<128x128xf32>
    %cst_11 = arith.constant 0.000000e+00 : f32
    %16 = vector.broadcast %cst_11 : f32 to vector<128x128xf32>
    %17 = arith.maximumf %15, %16 : vector<128x128xf32>
    %18 = arith.truncf %17 : vector<128x128xf32> to vector<128x128xbf16>
    %cst_12 = arith.constant dense<0.000000e+00> : vector<128x128xf32>
    %19 = tpu.matmul %0, %18, %cst_12 {dimension_numbers = #tpu.dot_dimension_numbers<[1], [0], [0], [1], [0, 0, 1, 1], [], []>} : vector<128x128xbf16>, vector<128x128xbf16>, vector<128x128xf32> -> vector<128x128xf32>
    %cst_13 = arith.constant 1.000000e+00 : f32
    %20 = vector.broadcast %cst_13 : f32 to vector<128x128xf32>
    %21 = arith.mulf %20, %17 : vector<128x128xf32>
    %22 = arith.addf %21, %19 : vector<128x128xf32>
    %23 = arith.truncf %22 : vector<128x128xf32> to vector<128x128xbf16>
    %c0_14 = arith.constant 0 : index
    %c0_15 = arith.constant 0 : index
    %24 = vector.load %arg5[%c0_14, %c0_15] : memref<128x128xbf16, #tpu.memory_space<vmem>>, vector<128x128xbf16>
    %cst_16 = arith.constant dense<0.000000e+00> : vector<128x128xf32>
    %25 = tpu.matmul %23, %24, %cst_16 {dimension_numbers = #tpu.dot_dimension_numbers<[1], [0], [0], [1], [0, 0, 1, 1], [], []>} : vector<128x128xbf16>, vector<128x128xbf16>, vector<128x128xf32> -> vector<128x128xf32>
    %c0_17 = arith.constant 0 : index
    %c0_18 = arith.constant 0 : index
    %26 = vector.load %arg6[%c0_17, %c0_18] : memref<1x128xf32, #tpu.memory_space<vmem>>, vector<1x128xf32>
    %27 = vector.broadcast %26 : vector<1x128xf32> to vector<128x128xf32>
    %28 = arith.addf %25, %27 : vector<128x128xf32>
    %cst_19 = arith.constant 0.000000e+00 : f32
    %29 = vector.broadcast %cst_19 : f32 to vector<128x128xf32>
    %30 = arith.maximumf %28, %29 : vector<128x128xf32>
    %31 = arith.truncf %30 : vector<128x128xf32> to vector<128x128xbf16>
    %c0_20 = arith.constant 0 : index
    %c0_21 = arith.constant 0 : index
    %32 = vector.load %arg7[%c0_20, %c0_21] : memref<128x128xbf16, #tpu.memory_space<vmem>>, vector<128x128xbf16>
    tpu.vector_store %arg7[%c0_20, %c0_21], %31 {strides = array<i32>} : memref<128x128xbf16, #tpu.memory_space<vmem>>, vector<128x128xbf16>,
    %33 = tpu.transpose %30, [1, 0] : vector<128x128xf32> -> vector<128x128xf32>
    %34 = arith.truncf %33 : vector<128x128xf32> to vector<128x128xbf16>
    %c0_22 = arith.constant 0 : index
    %c0_23 = arith.constant 0 : index
    %35 = vector.load %arg8[%c0_22, %c0_23] : memref<128x128xbf16, #tpu.memory_space<vmem>>, vector<128x128xbf16>
    tpu.vector_store %arg8[%c0_22, %c0_23], %34 {strides = array<i32>} : memref<128x128xbf16, #tpu.memory_space<vmem>>, vector<128x128xbf16>,
    return
  }
}

module attributes {stable_mosaic.version = 11 : i64} {
  func.func @_gin_decoder_kernel(%arg0: i32, %arg1: memref<128x128xbf16, #tpu.memory_space<vmem>>, %arg2: memref<128x128xbf16, #tpu.memory_space<vmem>>, %arg3: memref<128x128xbf16, #tpu.memory_space<vmem>>) attributes {dimension_semantics = [#tpu.dimension_semantics<parallel>], iteration_bounds = array<i64: 1>, scalar_prefetch = 0 : i64, scratch_operands = 0 : i64, tpu.core_type = #tpu.core_type<tc>, window_params = [{transform_indices = @transform_0, window_bounds = array<i64: 128, 128>}, {pipeline_mode = #tpu.pipeline_mode<synchronous>, transform_indices = @transform_1, window_bounds = array<i64: 128, 128>}, {transform_indices = @transform_2, window_bounds = array<i64: 128, 128>}]} {
    %c0 = arith.constant 0 : index
    %c0_0 = arith.constant 0 : index
    %0 = vector.load %arg1[%c0, %c0_0] : memref<128x128xbf16, #tpu.memory_space<vmem>>, vector<128x128xbf16>
    %c0_1 = arith.constant 0 : index
    %c0_2 = arith.constant 0 : index
    %1 = vector.load %arg2[%c0_1, %c0_2] : memref<128x128xbf16, #tpu.memory_space<vmem>>, vector<128x128xbf16>
    %cst = arith.constant dense<0.000000e+00> : vector<128x128xf32>
    %2 = tpu.matmul %0, %1, %cst {dimension_numbers = #tpu.dot_dimension_numbers<[1], [0], [0], [1], [0, 0, 1, 1], [], []>} : vector<128x128xbf16>, vector<128x128xbf16>, vector<128x128xf32> -> vector<128x128xf32>
    %3 = arith.negf %2 : vector<128x128xf32>
    %4 = math.exp %3 : vector<128x128xf32>
    %cst_3 = arith.constant 1.000000e+00 : f32
    %5 = vector.broadcast %cst_3 : f32 to vector<128x128xf32>
    %6 = arith.addf %5, %4 : vector<128x128xf32>
    %7 = arith.divf %5, %6 : vector<128x128xf32>
    %8 = arith.truncf %7 : vector<128x128xf32> to vector<128x128xbf16>
    %c0_4 = arith.constant 0 : index
    %c0_5 = arith.constant 0 : index
    %9 = vector.load %arg3[%c0_4, %c0_5] : memref<128x128xbf16, #tpu.memory_space<vmem>>, vector<128x128xbf16>
    tpu.vector_store %arg3[%c0_4, %c0_5], %8 {strides = array<i32>} : memref<128x128xbf16, #tpu.memory_space<vmem>>, vector<128x128xbf16>,
    return
  }
  func.func @transform_0(%arg0: i32) -> (i32, i32) {
    %c0_i32 = arith.constant 0 : i32
    %c0_i32_0 = arith.constant 0 : i32
    return %arg0, %c0_i32 : i32, i32
  }
  func.func @transform_1(%arg0: i32) -> (i32, i32) {
    %c0_i32 = arith.constant 0 : i32
    %c0_i32_0 = arith.constant 0 : i32
    %c0_i32_1 = arith.constant 0 : i32
    return %c0_i32, %c0_i32_0 : i32, i32
  }
  func.func @transform_2(%arg0: i32) -> (i32, i32) {
    %c0_i32 = arith.constant 0 : i32
    %c0_i32_0 = arith.constant 0 : i32
    return %arg0, %c0_i32 : i32, i32
  }
}

</mosaic_0001>

<bundles_post_ra>
// kernel: gin_forward.3
= control target key start
LH: loop header
LB: loop body
LE: loop exit
PB: predicated region body
PF: predicated region fallthrough
CT: control target
= control target key end

     0   :  { %s759_s1 = inlined_call_operand.vmem [shape: bf16[128,128], index: 1, kind: input, shape index: {}]   ;;  %s760_s0 = inlined_call_operand.vmem [shape: bf16[128,128], index: 0, kind: input, shape index: {}]   ;;  %s761_s2 = inlined_call_operand.vmem [shape: bf16[128,128], index: 2, kind: output, shape index: {}]  }
   0x1   :  { %v592_v0 = vld [vmem:[%s759_s1] sm:$0xff]   ;;  %v593_v1 = vld [vmem:[%s759_s1 + $0x8] sm:$0xff]   ;;  %v594_v2 = vld [vmem:[%s759_s1 + $0x10] sm:$0xff]  }
   0x2   :  { %544 = vmatprep.subr.bf16.mxu0 %v592_v0  ;;  %576 = vmatprep.subr.bf16.mxu1 %v592_v0  ;;  %v595_v3 = vld [vmem:[%s759_s1 + $0x18] sm:$0xff]   ;;  %v600_v4 = vld [vmem:[%s760_s0] sm:$0xff]   ;;  %v597_v7 = vld [vmem:[%s759_s1 + $0x28] sm:$0xff]  }
   0x3   :  { %545 = vmatpush3.bf16.msra.mxu0 %v592_v0  ;;  %584 = vmatpush3.bf16.msra.mxu1 %v592_v0  ;;  %v601_v5 = vld [vmem:[%s760_s0 + $0x20] sm:$0xff]   ;;  %v598_v8 = vld [vmem:[%s759_s1 + $0x30] sm:$0xff]   ;;  %v599_v9 = vld [vmem:[%s759_s1 + $0x38] sm:$0xff]  }
   0x4   :  { %546 = vmatprep.subr.bf16.mxu0 %v593_v1  ;;  %577 = vmatprep.subr.bf16.mxu1 %v593_v1  ;;  %v596_v6 = vld [vmem:[%s759_s1 + $0x20] sm:$0xff]   ;;  %v602_v10 = vld [vmem:[%s760_s0 + $0x8] sm:$0xff]   ;;  %v604_v12 = vld [vmem:[%s760_s0 + $0x10] sm:$0xff]  }
   0x5   :  { %560 = vmatprep.mubr.bf16.mxu0 %v600_v4  ;;  %568 = vmatprep.mubr.bf16.mxu1 %v601_v5  ;;  %v603_v11 = vld [vmem:[%s760_s0 + $0x28] sm:$0xff]   ;;  %v605_v13 = vld [vmem:[%s760_s0 + $0x30] sm:$0xff]   ;;  %v606_v14 = vld [vmem:[%s760_s0 + $0x18] sm:$0xff]  }
   0x6   :  { %v607_v15 = vld [vmem:[%s760_s0 + $0x38] sm:$0xff]  }
   0x7   :  { %547 = vmatpush3.bf16.msra.mxu0 %v593_v1  ;;  %585 = vmatpush3.bf16.msra.mxu1 %v593_v1 }
   0x8   :  { %548 = vmatprep.subr.bf16.mxu0 %v594_v2  ;;  %578 = vmatprep.subr.bf16.mxu1 %v594_v2 }
   0xb   :  { %549 = vmatpush3.bf16.msra.mxu0 %v594_v2  ;;  %586 = vmatpush3.bf16.msra.mxu1 %v594_v2 }
   0xc   :  { %550 = vmatprep.subr.bf16.mxu0 %v595_v3  ;;  %579 = vmatprep.subr.bf16.mxu1 %v595_v3 }
   0xf   :  { %551 = vmatpush3.bf16.msra.mxu0 %v595_v3  ;;  %587 = vmatpush3.bf16.msra.mxu1 %v595_v3 }
  0x10   :  { %552 = vmatprep.subr.bf16.mxu0 %v596_v6  ;;  %580 = vmatprep.subr.bf16.mxu1 %v596_v6 }
  0x13   :  { %553 = vmatpush3.bf16.msra.mxu0 %v596_v6  ;;  %588 = vmatpush3.bf16.msra.mxu1 %v596_v6 }
  0x14   :  { %554 = vmatprep.subr.bf16.mxu0 %v597_v7  ;;  %581 = vmatprep.subr.bf16.mxu1 %v597_v7 }
  0x17   :  { %555 = vmatpush3.bf16.msra.mxu0 %v597_v7  ;;  %589 = vmatpush3.bf16.msra.mxu1 %v597_v7 }
  0x18   :  { %556 = vmatprep.subr.bf16.mxu0 %v598_v8  ;;  %582 = vmatprep.subr.bf16.mxu1 %v598_v8 }
  0x1b   :  { %557 = vmatpush3.bf16.msra.mxu0 %v598_v8  ;;  %590 = vmatpush3.bf16.msra.mxu1 %v598_v8 }
  0x1c   :  { %558 = vmatprep.subr.bf16.mxu0 %v599_v9  ;;  %583 = vmatprep.subr.bf16.mxu1 %v599_v9 }
  0x1f   :  { %559 = vmatpush3.bf16.msra.mxu0 %v599_v9  ;;  %591 = vmatpush3.bf16.msra.mxu1 %v599_v9 }
  0x22   :  { %561 = vmatmul.mubr.bf16.vlgmr.msra.gmra.mrb[0].mxu0 %v602_v10  ;;  %569 = vmatmul.mubr.bf16.vlgmr.msra.gmra.mrb[0].mxu1 %v603_v11 }
  0x23   :  { %564 = vmatprep.mubr.bf16.mxu0 %v604_v12  ;;  %572 = vmatprep.mubr.bf16.mxu1 %v605_v13 }
  0x2a   :  { %565 = vmatmul.mubr.bf16.gmra.mrb[4].mxu0 %v606_v14  ;;  %573 = vmatmul.mubr.bf16.gmra.mrb[4].mxu1 %v607_v15 }
  0xf5   :  { %v562_v16 = vpop.f32.mrb[0].mxu0  ;;  %v570_v17 = vpop.f32.mrb[0].mxu1 }
  0xf6   :  { %v435_v18 = vmul.f32 -1.442695, %v562_v16  ;;  %v443_v19 = vmul.f32 -1.442695, %v570_v17  ;;  %v174_v20 = vpop.f32.mrb[1].mxu0  ;;  %v206_v21 = vpop.f32.mrb[1].mxu1 }
  0xf7   :  { %v433_v22 = vmul.f32 -1.442695, %v174_v20  ;;  %v441_v23 = vmul.f32 -1.442695, %v206_v21  ;;  %v563_v24 = vpop.f32.mrb[2].mxu0  ;;  %v571_v25 = vpop.f32.mrb[2].mxu1 }
  0xf8   :  { %608 = vpow2.f32 %v435_v18  ;;  %v436_v26 = vmul.f32 -1.442695, %v563_v24  ;;  %v177_v27 = vpop.f32.mrb[3].mxu0  ;;  %v209_v28 = vpop.f32.mrb[3].mxu1  ;;  %v444_v29 = vmul.f32 -1.442695, %v571_v25 }
  0xf9   :  { %610 = vpow2.f32 %v443_v19  ;;  %v434_v30 = vmul.f32 -1.442695, %v177_v27  ;;  %v442_v31 = vmul.f32 -1.442695, %v209_v28 }
  0xfa   :  { %612 = vpow2.f32 %v433_v22 }
  0xfb   :  { %614 = vpow2.f32 %v441_v23 }
  0xfc   :  { %616 = vpow2.f32 %v436_v26 }
  0xfd   :  { %618 = vpow2.f32 %v444_v29  ;;  %v566_v32 = vpop.f32.mrb[4].mxu0  ;;  %v574_v33 = vpop.f32.mrb[4].mxu1 }
  0xfe   :  { %620 = vpow2.f32 %v434_v30  ;;  %v439_v34 = vmul.f32 -1.442695, %v566_v32  ;;  %v447_v35 = vmul.f32 -1.442695, %v574_v33  ;;  %v190_v36 = vpop.f32.mrb[5].mxu0  ;;  %v222_v37 = vpop.f32.mrb[5].mxu1 }
  0xff   :  { %622 = vpow2.f32 %v442_v31  ;;  %v437_v38 = vmul.f32 -1.442695, %v190_v36  ;;  %v567_v39 = vpop.f32.mrb[6].mxu0  ;;  %v575_v40 = vpop.f32.mrb[6].mxu1  ;;  %v445_v59 = vmul.f32 -1.442695, %v222_v37 }
 0x100   :  { %624 = vpow2.f32 %v439_v34  ;;  %v440_v41 = vmul.f32 -1.442695, %v567_v39  ;;  %v193_v42 = vpop.f32.mrb[7].mxu0  ;;  %v225_v43 = vpop.f32.mrb[7].mxu1  ;;  %v448_v2 = vmul.f32 -1.442695, %v575_v40 }
 0x101   :  { %626 = vpow2.f32 %v447_v35  ;;  %v438_v5 = vmul.f32 -1.442695, %v193_v42  ;;  %v446_v7 = vmul.f32 -1.442695, %v225_v43 }
 0x102   :  { %v609_v44 = vpop.eup %608  ;;  %628 = vpow2.f32 %v437_v38 }
 0x103   :  { %v611_v45 = vpop.eup %610  ;;  %v287_v46 = vadd.f32 1.0, %v609_v44  ;;  %630 = vpow2.f32 %v440_v41 }
 0x104   :  { %v613_v47 = vpop.eup %612  ;;  %v295_v48 = vadd.f32 1.0, %v611_v45 }
 0x105   :  { %v615_v49 = vpop.eup %614  ;;  %632 = vrcp.f32 %v287_v46  ;;  %v285_v50 = vadd.f32 1.0, %v613_v47 }
 0x106   :  { %v617_v51 = vpop.eup %616  ;;  %634 = vrcp.f32 %v295_v48  ;;  %v293_v52 = vadd.f32 1.0, %v615_v49 }
 0x107   :  { %v619_v53 = vpop.eup %618  ;;  %636 = vrcp.f32 %v285_v50  ;;  %v288_v54 = vadd.f32 1.0, %v617_v51 }
 0x108   :  { %v621_v55 = vpop.eup %620  ;;  %638 = vrcp.f32 %v293_v52  ;;  %v296_v56 = vadd.f32 1.0, %v619_v53 }
 0x109   :  { %v623_v57 = vpop.eup %622  ;;  %640 = vrcp.f32 %v288_v54  ;;  %v286_v58 = vadd.f32 1.0, %v621_v55 }
 0x10a   :  { %v625_v60 = vpop.eup %624  ;;  %642 = vrcp.f32 %v296_v56  ;;  %v294_v61 = vadd.f32 1.0, %v623_v57 }
 0x10b   :  { %644 = vrcp.f32 %v286_v58  ;;  %v627_v62 = vpop.eup %626  ;;  %v291_v63 = vadd.f32 1.0, %v625_v60 }
 0x10c   :  { %646 = vrcp.f32 %v294_v61  ;;  %v629_v0 = vpop.eup %628  ;;  %v299_v19 = vadd.f32 1.0, %v627_v62 }
 0x10d   :  { %648 = vpow2.f32 %v445_v59  ;;  %v631_v1 = vpop.eup %630  ;;  %v289_v20 = vadd.f32 1.0, %v629_v0 }
 0x10e   :  { %v292_v4 = vadd.f32 1.0, %v631_v1  ;;  %650 = vrcp.f32 %v291_v63 }
 0x10f   :  { %v633_v3 = vpop.eup %632 }
 0x110   :  { %v635_v6 = vpop.eup %634  ;;  %652 = vrcp.f32 %v292_v4 }
 0x111   :  { %v637_v8 = vpop.eup %636  ;;  %654 = vpow2.f32 %v448_v2 }
 0x112   :  { %v639_v9 = vpop.eup %638  ;;  %656 = vpow2.f32 %v438_v5 }
 0x113   :  { %v641_v10 = vpop.eup %640  ;;  %658 = vpow2.f32 %v446_v7 }
 0x114   :  { %v643_v11 = vpop.eup %642  ;;  %v489_v12 = vpack.c.bf16 %v641_v10, %v633_v3  ;;  %660 = vrcp.f32 %v299_v19 }
 0x115   :  { %v645_v13 = vpop.eup %644  ;;  %v509_v14 = vpack.c.bf16 %v643_v11, %v635_v6  ;;  %662 = vrcp.f32 %v289_v20 }
 0x116   :  { %v647_v15 = vpop.eup %646  ;;  %521 = vst [vmem:[%s761_s2 + $0x8] sm:$0xff] %v489_v12   ;;  %v484_v16 = vpack.c.bf16 %v645_v13, %v637_v8 }
 0x117   :  { %v649_v17 = vpop.eup %648  ;;  %525 = vst [vmem:[%s761_s2 + $0x28] sm:$0xff] %v509_v14   ;;  %v504_v18 = vpack.c.bf16 %v647_v15, %v639_v9 }
 0x118   :  { %485 = vst [vmem:[%s761_s2] sm:$0xff] %v484_v16   ;;  %v651_v21 = vpop.eup %650  ;;  %v297_v22 = vadd.f32 1.0, %v649_v17 }
 0x119   :  { %524 = vst [vmem:[%s761_s2 + $0x20] sm:$0xff] %v504_v18  }
 0x11a   :  { %v653_v23 = vpop.eup %652  ;;  %664 = vrcp.f32 %v297_v22 }
 0x11b   :  { %v655_v24 = vpop.eup %654  ;;  %v499_v25 = vpack.c.bf16 %v653_v23, %v651_v21 }
 0x11c   :  { %v657_v26 = vpop.eup %656  ;;  %v300_v27 = vadd.f32 1.0, %v655_v24 }
 0x11d   :  { %v659_v28 = vpop.eup %658  ;;  %523 = vst [vmem:[%s761_s2 + $0x18] sm:$0xff] %v499_v25   ;;  %v290_v29 = vadd.f32 1.0, %v657_v26 }
 0x11e   :  { %666 = vrcp.f32 %v300_v27  ;;  %v298_v30 = vadd.f32 1.0, %v659_v28  ;;  %v661_v31 = vpop.eup %660 }
 0x11f   :  { %668 = vrcp.f32 %v290_v29  ;;  %v663_v32 = vpop.eup %662 }
 0x120   :  { %670 = vrcp.f32 %v298_v30 }
 0x124   :  { %v665_v33 = vpop.eup %664 }
 0x128   :  { %v667_v34 = vpop.eup %666 }
 0x129   :  { %v669_v35 = vpop.eup %668  ;;  %v519_v36 = vpack.c.bf16 %v667_v34, %v661_v31 }
 0x12a   :  { %v671_v37 = vpop.eup %670  ;;  %v494_v38 = vpack.c.bf16 %v669_v35, %v663_v32 }
 0x12b   :  { %527 = vst [vmem:[%s761_s2 + $0x38] sm:$0xff] %v519_v36   ;;  %v514_v39 = vpack.c.bf16 %v671_v37, %v665_v33 }
 0x12c   :  { %522 = vst [vmem:[%s761_s2 + $0x10] sm:$0xff] %v494_v38  }
 0x12d   :  { %526 = vst [vmem:[%s761_s2 + $0x30] sm:$0xff] %v514_v39  }

// kernel: gin_forward.2
= control target key start
LH: loop header
LB: loop body
LE: loop exit
PB: predicated region body
PF: predicated region fallthrough
CT: control target
= control target key end

     0   :  { %v1450_v3 = vmov 0   ;;  %s1940_s1 = inlined_call_operand.vmem [shape: f32[128,128], index: 1, kind: input, shape index: {}]   ;;  %s1941_s0 = inlined_call_operand.vmem [shape: bf16[128,128], index: 0, kind: input, shape index: {}]   ;;  %s1942_s2 = inlined_call_operand.vmem [shape: f32[128,1], index: 2, kind: input, shape index: {}]   ;;  %s1943_s3 = inlined_call_operand.vmem [shape: bf16[128,128], index: 3, kind: input, shape index: {}]   ;;  %s1944_s5 = inlined_call_operand.vmem [shape: bf16[128,128], index: 5, kind: input, shape index: {}]   ;;  %s1945_s4 = inlined_call_operand.vmem [shape: f32[1,128], index: 4, kind: input, shape index: {}]   ;;  %s1946_s6 = inlined_call_operand.vmem [shape: f32[1,128], index: 6, kind: input, shape index: {}]   ;;  %s1947_s7 = inlined_call_operand.vmem [shape: bf16[128,128], index: 7, kind: output, shape index: {0}]   ;;  %s1948_s8 = inlined_call_operand.vmem [shape: bf16[128,128], index: 8, kind: output, shape index: {1}]  }
   0x1   :  { %v1499_v0 = vld [vmem:[%s1940_s1] sm:$0xff]  ;;  %v1504_v1 = vld [vmem:[%s1940_s1 + $0x8] sm:$0xff]  ;;  %v1509_v2 = vld [vmem:[%s1940_s1 + $0x10] sm:$0xff]  ;;  %1424 = vset.pattern.permute.xlu0 %v1450_v3  ;;  %1425 = vset.pattern.permute.xlu1 %v1450_v3 }
   0x2   :  { %v61_v4 = vpack.c.bf16 %v1504_v1, %v1499_v0  ;;  %v1516_v5 = vld [vmem:[%s1940_s1 + $0x18] sm:$0xff]  ;;  %v1523_v7 = vld [vmem:[%s1940_s1 + $0x20] sm:$0xff]  ;;  %v1528_v8 = vld [vmem:[%s1940_s1 + $0x28] sm:$0xff] }
   0x3   :  { %v62_v6 = vpack.c.bf16 %v1516_v5, %v1509_v2  ;;  %v1533_v9 = vld [vmem:[%s1940_s1 + $0x30] sm:$0xff]  ;;  %v63_v10 = vpack.c.bf16 %v1528_v8, %v1523_v7  ;;  %v1540_v11 = vld [vmem:[%s1940_s1 + $0x38] sm:$0xff]  ;;  %v1545_v12 = vld [vmem:[%s1941_s0] sm:$0xff]  }
   0x4   :  { %1295 = vmatprep.subr.bf16.mxu0 %v61_v4  ;;  %1311 = vmatprep.mubr.bf16.mxu0 %v1545_v12  ;;  %v64_v13 = vpack.c.bf16 %v1540_v11, %v1533_v9  ;;  %v1553_v14 = vld [vmem:[%s1940_s1 + $0x40] sm:$0xff]  ;;  %v1558_v15 = vld [vmem:[%s1940_s1 + $0x48] sm:$0xff]  ;;  %v216_v18 = vld [vmem:[%s1942_s2 + $0x10] sm:$0xff] }
   0x5   :  { %1296 = vmatpush3.bf16.msra.mxu0 %v61_v4  ;;  %v65_v16 = vpack.c.bf16 %v1558_v15, %v1553_v14  ;;  %v214_v17 = vld [vmem:[%s1942_s2] sm:$0xff]  ;;  %v1571_v19 = vld [vmem:[%s1940_s1 + $0x50] sm:$0xff]  ;;  %v1576_v20 = vld [vmem:[%s1940_s1 + $0x58] sm:$0xff]  ;;  %242 = vperm.xlu1 %1425, %v216_v18  }
   0x6   :  { %1297 = vmatprep.subr.bf16.mxu0 %v62_v6  ;;  %232 = vperm.xlu0 %1424, %v214_v17   ;;  %v215_v21 = vld [vmem:[%s1942_s2 + $0x8] sm:$0xff]  ;;  %v217_v22 = vld [vmem:[%s1942_s2 + $0x18] sm:$0xff]  ;;  %v66_v23 = vpack.c.bf16 %v1576_v20, %v1571_v19  ;;  %v1589_v24 = vld [vmem:[%s1940_s1 + $0x60] sm:$0xff] }
   0x7   :  { %v1594_v25 = vld [vmem:[%s1940_s1 + $0x68] sm:$0xff]  ;;  %v218_v26 = vld [vmem:[%s1942_s2 + $0x20] sm:$0xff]  ;;  %v1608_v29 = vld [vmem:[%s1940_s1 + $0x70] sm:$0xff] }
   0x8   :  { %v219_v27 = vld [vmem:[%s1942_s2 + $0x28] sm:$0xff]  ;;  %v1434_v28 = vld [vmem:[%s1943_s3] sm:$0xff]   ;;  %v1613_v30 = vld [vmem:[%s1940_s1 + $0x78] sm:$0xff]  ;;  %v67_v31 = vpack.c.bf16 %v1594_v25, %v1589_v24 }
   0x9   :  { %1298 = vmatpush3.bf16.msra.mxu0 %v62_v6  ;;  %247 = vperm.xlu1 %1425, %v217_v22   ;;  %v220_v32 = vld [vmem:[%s1942_s2 + $0x30] sm:$0xff]  ;;  %v221_v33 = vld [vmem:[%s1942_s2 + $0x38] sm:$0xff]  ;;  %v1435_v34 = vld [vmem:[%s1943_s3 + $0x8] sm:$0xff]   ;;  %v68_v35 = vpack.c.bf16 %v1613_v30, %v1608_v29 }
   0xa   :  { %1299 = vmatprep.subr.bf16.mxu0 %v63_v10  ;;  %237 = vperm.xlu0 %1424, %v215_v21   ;;  %v1436_v36 = vld [vmem:[%s1943_s3 + $0x10] sm:$0xff]   ;;  %v222_v37 = vld [vmem:[%s1942_s2 + $0x40] sm:$0xff]  ;;  %v223_v38 = vld [vmem:[%s1942_s2 + $0x48] sm:$0xff] }
   0xb   :  { %1327 = vmatprep.subr.bf16.mxu1 %v1434_v28  ;;  %v1437_v39 = vld [vmem:[%s1943_s3 + $0x18] sm:$0xff]   ;;  %v1643_v40 = vld [vmem:[%s1941_s0 + $0x8] sm:$0xff]   ;;  %v224_v41 = vld [vmem:[%s1942_s2 + $0x50] sm:$0xff] }
   0xc   :  { %1328 = vmatpush3.bf16.msra.mxu1 %v1434_v28  ;;  %v225_v42 = vld [vmem:[%s1942_s2 + $0x58] sm:$0xff]  ;;  %v1654_v43 = vld [vmem:[%s1941_s0 + $0x10] sm:$0xff]   ;;  %v1438_v44 = vld [vmem:[%s1943_s3 + $0x20] sm:$0xff]  }
   0xd   :  { %1300 = vmatpush3.bf16.msra.mxu0 %v63_v10  ;;  %257 = vperm.xlu1 %1425, %v219_v27   ;;  %v226_v45 = vld [vmem:[%s1942_s2 + $0x60] sm:$0xff]  ;;  %v227_v46 = vld [vmem:[%s1942_s2 + $0x68] sm:$0xff]  ;;  %v1673_v48 = vld [vmem:[%s1941_s0 + $0x18] sm:$0xff]  }
   0xe   :  { %1301 = vmatprep.subr.bf16.mxu0 %v64_v13  ;;  %252 = vperm.xlu0 %1424, %v218_v26   ;;  %v1439_v47 = vld [vmem:[%s1943_s3 + $0x28] sm:$0xff]   ;;  %v228_v49 = vld [vmem:[%s1942_s2 + $0x70] sm:$0xff]  ;;  %v229_v50 = vld [vmem:[%s1942_s2 + $0x78] sm:$0xff] }
   0xf   :  { %1329 = vmatprep.subr.bf16.mxu1 %v1435_v34  ;;  %v1684_v51 = vld [vmem:[%s1941_s0 + $0x20] sm:$0xff]   ;;  %v1691_v52 = vld [vmem:[%s1941_s0 + $0x28] sm:$0xff]   ;;  %v1696_v53 = vld [vmem:[%s1941_s0 + $0x30] sm:$0xff]  }
  0x10   :  { %1330 = vmatpush3.bf16.msra.mxu1 %v1435_v34  ;;  %v1703_v54 = vld [vmem:[%s1941_s0 + $0x38] sm:$0xff]   ;;  %v1440_v55 = vld [vmem:[%s1943_s3 + $0x30] sm:$0xff]  }
  0x11   :  { %1302 = vmatpush3.bf16.msra.mxu0 %v64_v13  ;;  %267 = vperm.xlu1 %1425, %v221_v33   ;;  %v1441_v56 = vld [vmem:[%s1943_s3 + $0x38] sm:$0xff]  }
  0x12   :  { %1303 = vmatprep.subr.bf16.mxu0 %v65_v16  ;;  %262 = vperm.xlu0 %1424, %v220_v32  }
  0x13   :  { %1331 = vmatprep.subr.bf16.mxu1 %v1436_v36 }
  0x14   :  { %1332 = vmatpush3.bf16.msra.mxu1 %v1436_v36 }
  0x15   :  { %1304 = vmatpush3.bf16.msra.mxu0 %v65_v16  ;;  %277 = vperm.xlu1 %1425, %v223_v38  }
  0x16   :  { %1305 = vmatprep.subr.bf16.mxu0 %v66_v23  ;;  %272 = vperm.xlu0 %1424, %v222_v37  }
  0x17   :  { %1333 = vmatprep.subr.bf16.mxu1 %v1437_v39 }
  0x18   :  { %1334 = vmatpush3.bf16.msra.mxu1 %v1437_v39 }
  0x19   :  { %1306 = vmatpush3.bf16.msra.mxu0 %v66_v23  ;;  %287 = vperm.xlu1 %1425, %v225_v42  }
  0x1a   :  { %1307 = vmatprep.subr.bf16.mxu0 %v67_v31  ;;  %282 = vperm.xlu0 %1424, %v224_v41  }
  0x1b   :  { %1335 = vmatprep.subr.bf16.mxu1 %v1438_v44 }
  0x1c   :  { %1336 = vmatpush3.bf16.msra.mxu1 %v1438_v44 }
  0x1d   :  { %1308 = vmatpush3.bf16.msra.mxu0 %v67_v31  ;;  %297 = vperm.xlu1 %1425, %v227_v46  }
  0x1e   :  { %1309 = vmatprep.subr.bf16.mxu0 %v68_v35  ;;  %292 = vperm.xlu0 %1424, %v226_v45  }
  0x1f   :  { %1337 = vmatprep.subr.bf16.mxu1 %v1439_v47 }
  0x20   :  { %1338 = vmatpush3.bf16.msra.mxu1 %v1439_v47 }
  0x21   :  { %1310 = vmatpush3.bf16.msra.mxu0 %v68_v35  ;;  %307 = vperm.xlu1 %1425, %v229_v50  }
  0x22   :  { %302 = vperm.xlu0 %1424, %v228_v49   ;;  %1339 = vmatprep.subr.bf16.mxu1 %v1440_v55 }
  0x24   :  { %1312 = vmatmul.mubr.bf16.vlgmr.msra.gmra.mrb[0].mxu0 %v1643_v40  ;;  %1340 = vmatpush3.bf16.msra.mxu1 %v1440_v55 }
  0x25   :  { %1315 = vmatprep.mubr.bf16.mxu0 %v1654_v43  ;;  %1341 = vmatprep.subr.bf16.mxu1 %v1441_v56 }
  0x28   :  { %1342 = vmatpush3.bf16.msra.mxu1 %v1441_v56 }
  0x2c   :  { %1316 = vmatmul.mubr.bf16.gmra.mrb[4].mxu0 %v1673_v48 }
  0x2d   :  { %1319 = vmatprep.mubr.bf16.mxu0 %v1684_v51 }
  0x34   :  { %1320 = vmatmul.mubr.bf16.gmra.mrb[8].mxu0 %v1691_v52 }
  0x35   :  { %1323 = vmatprep.mubr.bf16.mxu0 %v1696_v53 }
  0x3c   :  { %1324 = vmatmul.mubr.bf16.gmra.mrb[12].mxu0 %v1703_v54 }
  0x3d   :  { %1375 = vmatprep.mubr.bf16.mxu0 %v1545_v12 }
  0x84   :  { %v243_v58 = vpop.permute.xlu1 %242 }
  0x85   :  { %v233_v57 = vpop.permute.xlu0 %232 }
  0x88   :  { %v248_v60 = vpop.permute.xlu1 %247 }
  0x89   :  { %v238_v59 = vpop.permute.xlu0 %237 }
  0x8c   :  { %v258_v62 = vpop.permute.xlu1 %257 }
  0x8d   :  { %v253_v61 = vpop.permute.xlu0 %252 }
  0x90   :  { %v268_v10 = vpop.permute.xlu1 %267 }
  0x91   :  { %v263_v63 = vpop.permute.xlu0 %262 }
  0x94   :  { %v278_v31 = vpop.permute.xlu1 %277 }
  0x95   :  { %v273_v23 = vpop.permute.xlu0 %272 }
  0x98   :  { %v288_v42 = vpop.permute.xlu1 %287 }
  0xf7   :  { %v1313_v3 = vpop.f32.mrb[0].mxu0 }
  0xf8   :  { %v312_v4 = vmul.f32 %v1313_v3, %v243_v58  ;;  %v151_v6 = vpop.f32.mrb[1].mxu0 }
  0xf9   :  { %v310_v12 = vmul.f32 %v233_v57, %v151_v6  ;;  %v1314_v13 = vpop.f32.mrb[2].mxu0 }
  0xfa   :  { %v313_v16 = vmul.f32 %v1314_v13, %v248_v60  ;;  %v154_v17 = vpop.f32.mrb[3].mxu0  ;;  %v328_v21 = vadd.f32 %v312_v4, %v1509_v2  ;;  %v283_v2 = vpop.permute.xlu0 %282 }
  0xfb   :  { %v311_v18 = vmul.f32 %v238_v59, %v154_v17  ;;  %v326_v26 = vadd.f32 %v310_v12, %v1499_v0 }
  0xfc   :  { %v329_v22 = vadd.f32 %v313_v16, %v1516_v5 }
  0xfd   :  { %v327_v27 = vadd.f32 %v311_v18, %v1504_v1 }
  0xfe   :  { %v343_v28 = vpack.c.bf16 %v329_v22, %v328_v21  ;;  %v293_v55 = vpop.permute.xlu0 %292 }
  0xff   :  { %v1317_v32 = vpop.f32.mrb[4].mxu0  ;;  %v342_v33 = vpack.c.bf16 %v327_v27, %v326_v26  ;;  %v1442_v26 = vld [vmem:[%s1944_s5] sm:$0xff]   ;;  %v1443_v27 = vld [vmem:[%s1944_s5 + $0x8] sm:$0xff]  }
 0x100   :  { %v316_v34 = vmul.f32 %v1317_v32, %v263_v63  ;;  %v167_v35 = vpop.f32.mrb[5].mxu0  ;;  %1391 = vmatprep.subr.bf16.mxu1 %v1442_v26 }
 0x101   :  { %v314_v36 = vmul.f32 %v253_v61, %v167_v35  ;;  %v1318_v37 = vpop.f32.mrb[6].mxu0  ;;  %1343 = vmatprep.mubr.bf16.mxu1 %v342_v33 }
 0x102   :  { %v317_v38 = vmul.f32 %v1318_v37, %v268_v10  ;;  %v170_v39 = vpop.f32.mrb[7].mxu0  ;;  %1344 = vmatmul.mubr.bf16.vlgmr.msra.gmra.mrb[0].mxu1 %v343_v28  ;;  %v332_v5 = vadd.f32 %v316_v34, %v1533_v9  ;;  %v298_v9 = vpop.permute.xlu1 %297  ;;  %v1055_v28 = vld [vmem:[%s1945_s4] ss:$0 sm:$0xff] }
 0x103   :  { %v315_v41 = vmul.f32 %v258_v62, %v170_v39  ;;  %v330_v1 = vadd.f32 %v314_v36, %v1523_v7  ;;  %v303_v63 = vpop.permute.xlu0 %302  ;;  %1392 = vmatpush3.bf16.msra.mxu1 %v1442_v26 }
 0x104   :  { %v333_v0 = vadd.f32 %v317_v38, %v1540_v11  ;;  %1393 = vmatprep.subr.bf16.mxu1 %v1443_v27 }
 0x105   :  { %v331_v44 = vadd.f32 %v315_v41, %v1528_v8 }
 0x106   :  { %v345_v45 = vpack.c.bf16 %v333_v0, %v332_v5  ;;  %v308_v12 = vpop.permute.xlu1 %307 }
 0x107   :  { %v1321_v46 = vpop.f32.mrb[8].mxu0  ;;  %v344_v47 = vpack.c.bf16 %v331_v44, %v330_v1  ;;  %1394 = vmatpush3.bf16.msra.mxu1 %v1443_v27 }
 0x108   :  { %v320_v49 = vmul.f32 %v1321_v46, %v283_v2  ;;  %v183_v50 = vpop.f32.mrb[9].mxu0 }
 0x109   :  { %v318_v56 = vmul.f32 %v273_v23, %v183_v50  ;;  %v1322_v57 = vpop.f32.mrb[10].mxu0  ;;  %1347 = vmatprep.mubr.bf16.mxu1 %v344_v47 }
 0x10a   :  { %v321_v58 = vmul.f32 %v1322_v57, %v288_v42  ;;  %v186_v59 = vpop.f32.mrb[11].mxu0  ;;  %1348 = vmatmul.mubr.bf16.gmra.mrb[4].mxu1 %v345_v45  ;;  %v336_v11 = vadd.f32 %v320_v49, %v1571_v19 }
 0x10b   :  { %v319_v60 = vmul.f32 %v278_v31, %v186_v59  ;;  %v334_v8 = vadd.f32 %v318_v56, %v1553_v14 }
 0x10c   :  { %v337_v7 = vadd.f32 %v321_v58, %v1576_v20 }
 0x10d   :  { %v335_v61 = vadd.f32 %v319_v60, %v1558_v15 }
 0x10e   :  { %v347_v62 = vpack.c.bf16 %v337_v7, %v336_v11 }
 0x10f   :  { %v1325_v3 = vpop.f32.mrb[12].mxu0  ;;  %v346_v4 = vpack.c.bf16 %v335_v61, %v334_v8 }
 0x110   :  { %v324_v6 = vmul.f32 %v1325_v3, %v303_v63  ;;  %v199_v10 = vpop.f32.mrb[13].mxu0 }
 0x111   :  { %v322_v13 = vmul.f32 %v293_v55, %v199_v10  ;;  %v1326_v16 = vpop.f32.mrb[14].mxu0  ;;  %1351 = vmatprep.mubr.bf16.mxu1 %v346_v4 }
 0x112   :  { %v325_v17 = vmul.f32 %v1326_v16, %v308_v12  ;;  %v202_v18 = vpop.f32.mrb[15].mxu0  ;;  %1352 = vmatmul.mubr.bf16.gmra.mrb[8].mxu1 %v347_v62  ;;  %v340_v20 = vadd.f32 %v324_v6, %v1608_v29  ;;  %v1446_v29 = vld [vmem:[%s1944_s5 + $0x20] sm:$0xff]  }
 0x113   :  { %v323_v19 = vmul.f32 %v298_v9, %v202_v18  ;;  %v338_v15 = vadd.f32 %v322_v13, %v1589_v24  ;;  %v1444_v24 = vld [vmem:[%s1944_s5 + $0x10] sm:$0xff]  }
 0x114   :  { %v341_v14 = vadd.f32 %v325_v17, %v1613_v30  ;;  %1395 = vmatprep.subr.bf16.mxu1 %v1444_v24  ;;  %v1447_v30 = vld [vmem:[%s1944_s5 + $0x28] sm:$0xff]  }
 0x115   :  { %v339_v21 = vadd.f32 %v323_v19, %v1594_v25  ;;  %v1445_v25 = vld [vmem:[%s1944_s5 + $0x18] sm:$0xff]   ;;  %1396 = vmatpush3.bf16.msra.mxu1 %v1444_v24 }
 0x116   :  { %v349_v22 = vpack.c.bf16 %v341_v14, %v340_v20  ;;  %1397 = vmatprep.subr.bf16.mxu1 %v1445_v25 }
 0x117   :  { %v348_v23 = vpack.c.bf16 %v339_v21, %v338_v15 }
 0x119   :  { %1355 = vmatprep.mubr.bf16.mxu1 %v348_v23  ;;  %1398 = vmatpush3.bf16.msra.mxu1 %v1445_v25 }
 0x11a   :  { %1356 = vmatmul.mubr.bf16.gmra.mrb[12].mxu1 %v349_v22  ;;  %1399 = vmatprep.subr.bf16.mxu1 %v1446_v29 }
 0x11d   :  { %1400 = vmatpush3.bf16.msra.mxu1 %v1446_v29 }
 0x11e   :  { %1401 = vmatprep.subr.bf16.mxu1 %v1447_v30 }
 0x121   :  { %1402 = vmatpush3.bf16.msra.mxu1 %v1447_v30 }
 0x1d5   :  { %v1345_v31 = vpop.f32.mrb[0].mxu1 }
 0x1d6   :  { %v455_v32 = vpop.f32.mrb[1].mxu1  ;;  %v1754_v37 = vadd.f32 %v1345_v31, %v1055_v28 }
 0x1d7   :  { %v1750_v33 = vadd.f32 %v1055_v28, %v455_v32  ;;  %v1346_v34 = vpop.f32.mrb[2].mxu1 }
 0x1d8   :  { %v1752_v35 = vadd.f32 %v1346_v34, %v1055_v28  ;;  %v458_v36 = vpop.f32.mrb[3].mxu1  ;;  %v520_v5 = vmax.f32 %v1754_v37, 0.0 }
 0x1d9   :  { %v1756_v38 = vadd.f32 %v1055_v28, %v458_v36  ;;  %v518_v39 = vmax.f32 %v1750_v33, 0.0 }
 0x1da   :  { %v521_v2 = vmax.f32 %v1752_v35, 0.0 }
 0x1db   :  { %v519_v41 = vmax.f32 %v1756_v38, 0.0 }
 0x1dc   :  { %v535_v44 = vpack.c.bf16 %v521_v2, %v520_v5 }
 0x1dd   :  { %v534_v0 = vpack.c.bf16 %v519_v41, %v518_v39  ;;  %v1349_v42 = vpop.f32.mrb[4].mxu1 }
 0x1de   :  { %v471_v1 = vpop.f32.mrb[5].mxu1  ;;  %v1774_v50 = vadd.f32 %v1349_v42, %v1055_v28 }
 0x1df   :  { %v1770_v45 = vadd.f32 %v1055_v28, %v471_v1  ;;  %v1350_v46 = vpop.f32.mrb[6].mxu1  ;;  %1359 = vmatprep.subr.bf16.mxu0 %v534_v0 }
 0x1e0   :  { %v1772_v47 = vadd.f32 %v1350_v46, %v1055_v28  ;;  %v474_v49 = vpop.f32.mrb[7].mxu1  ;;  %1360 = vmatpush3.bf16.msra.mxu0 %v534_v0  ;;  %v524_v59 = vmax.f32 %v1774_v50, 0.0 }
 0x1e1   :  { %v1776_v55 = vadd.f32 %v1055_v28, %v474_v49  ;;  %1361 = vmatprep.subr.bf16.mxu0 %v535_v44  ;;  %v522_v56 = vmax.f32 %v1770_v45, 0.0 }
 0x1e2   :  { %v525_v57 = vmax.f32 %v1772_v47, 0.0 }
 0x1e3   :  { %v523_v58 = vmax.f32 %v1776_v55, 0.0 }
 0x1e4   :  { %1362 = vmatpush3.bf16.msra.mxu0 %v535_v44  ;;  %v537_v7 = vpack.c.bf16 %v525_v57, %v524_v59 }
 0x1e5   :  { %v536_v9 = vpack.c.bf16 %v523_v58, %v522_v56  ;;  %v1353_v60 = vpop.f32.mrb[8].mxu1 }
 0x1e6   :  { %v487_v11 = vpop.f32.mrb[9].mxu1  ;;  %v1794_v3 = vadd.f32 %v1353_v60, %v1055_v28 }
 0x1e7   :  { %v1790_v8 = vadd.f32 %v1055_v28, %v487_v11  ;;  %v1354_v61 = vpop.f32.mrb[10].mxu1  ;;  %1363 = vmatprep.subr.bf16.mxu0 %v536_v9 }
 0x1e8   :  { %v1792_v62 = vadd.f32 %v1354_v61, %v1055_v28  ;;  %v490_v63 = vpop.f32.mrb[11].mxu1  ;;  %1364 = vmatpush3.bf16.msra.mxu0 %v536_v9  ;;  %v528_v13 = vmax.f32 %v1794_v3, 0.0  ;;  %v1874_v3 = vld [vmem:[%s1946_s6] ss:$0 sm:$0xff] }
 0x1e9   :  { %v1796_v4 = vadd.f32 %v1055_v28, %v490_v63  ;;  %1365 = vmatprep.subr.bf16.mxu0 %v537_v7  ;;  %v526_v6 = vmax.f32 %v1790_v8, 0.0 }
 0x1ea   :  { %v529_v10 = vmax.f32 %v1792_v62, 0.0 }
 0x1eb   :  { %v527_v12 = vmax.f32 %v1796_v4, 0.0 }
 0x1ec   :  { %1366 = vmatpush3.bf16.msra.mxu0 %v537_v7  ;;  %v539_v19 = vpack.c.bf16 %v529_v10, %v528_v13 }
 0x1ed   :  { %v538_v16 = vpack.c.bf16 %v527_v12, %v526_v6  ;;  %v1357_v17 = vpop.f32.mrb[12].mxu1 }
 0x1ee   :  { %v503_v18 = vpop.f32.mrb[13].mxu1  ;;  %v1814_v22 = vadd.f32 %v1357_v17, %v1055_v28 }
 0x1ef   :  { %v1810_v20 = vadd.f32 %v1055_v28, %v503_v18  ;;  %v1358_v14 = vpop.f32.mrb[14].mxu1  ;;  %1367 = vmatprep.subr.bf16.mxu0 %v538_v16 }
 0x1f0   :  { %v1812_v15 = vadd.f32 %v1358_v14, %v1055_v28  ;;  %v506_v21 = vpop.f32.mrb[15].mxu1  ;;  %1368 = vmatpush3.bf16.msra.mxu0 %v538_v16  ;;  %v532_v25 = vmax.f32 %v1814_v22, 0.0 }
 0x1f1   :  { %v1816_v23 = vadd.f32 %v1055_v28, %v506_v21  ;;  %1369 = vmatprep.subr.bf16.mxu0 %v539_v19  ;;  %v530_v26 = vmax.f32 %v1810_v20, 0.0  ;;  %v1448_v28 = vld [vmem:[%s1944_s5 + $0x30] sm:$0xff]  }
 0x1f2   :  { %v533_v27 = vmax.f32 %v1812_v15, 0.0  ;;  %1403 = vmatprep.subr.bf16.mxu1 %v1448_v28 }
 0x1f3   :  { %v531_v24 = vmax.f32 %v1816_v23, 0.0  ;;  %1404 = vmatpush3.bf16.msra.mxu1 %v1448_v28 }
 0x1f4   :  { %1370 = vmatpush3.bf16.msra.mxu0 %v539_v19  ;;  %v541_v30 = vpack.c.bf16 %v533_v27, %v532_v25 }
 0x1f5   :  { %v540_v29 = vpack.c.bf16 %v531_v24, %v530_v26 }
 0x1f7   :  { %1371 = vmatprep.subr.bf16.mxu0 %v540_v29 }
 0x1f8   :  { %1372 = vmatpush3.bf16.msra.mxu0 %v540_v29 }
 0x1f9   :  { %1373 = vmatprep.subr.bf16.mxu0 %v541_v30 }
 0x1fc   :  { %1374 = vmatpush3.bf16.msra.mxu0 %v541_v30 }
 0x1ff   :  { %1376 = vmatmul.mubr.bf16.vlgmr.msra.gmra.mrb[16].mxu0 %v1643_v40  ;;  %v1449_v40 = vld [vmem:[%s1944_s5 + $0x38] sm:$0xff]  }
 0x200   :  { %1379 = vmatprep.mubr.bf16.mxu0 %v1654_v43  ;;  %1405 = vmatprep.subr.bf16.mxu1 %v1449_v40 }
 0x201   :  { %1406 = vmatpush3.bf16.msra.mxu1 %v1449_v40 }
 0x207   :  { %1380 = vmatmul.mubr.bf16.gmra.mrb[20].mxu0 %v1673_v48 }
 0x208   :  { %1383 = vmatprep.mubr.bf16.mxu0 %v1684_v51 }
 0x20f   :  { %1384 = vmatmul.mubr.bf16.gmra.mrb[24].mxu0 %v1691_v52 }
 0x210   :  { %1387 = vmatprep.mubr.bf16.mxu0 %v1696_v53 }
 0x217   :  { %1388 = vmatmul.mubr.bf16.gmra.mrb[28].mxu0 %v1703_v54 }
 0x2d2   :  { %v1377_v43 = vpop.f32.mrb[16].mxu0 }
 0x2d3   :  { %v576_v48 = vpop.f32.mrb[17].mxu0  ;;  %v641_v52 = vadd.f32 %v1377_v43, %v520_v5 }
 0x2d4   :  { %v1378_v51 = vpop.f32.mrb[18].mxu0  ;;  %v639_v31 = vadd.f32 %v576_v48, %v518_v39 }
 0x2d5   :  { %v642_v53 = vadd.f32 %v1378_v51, %v521_v2  ;;  %v579_v54 = vpop.f32.mrb[19].mxu0 }
 0x2d6   :  { %v640_v32 = vadd.f32 %v579_v54, %v519_v41 }
 0x2d7   :  { %v656_v34 = vpack.c.bf16 %v642_v53, %v641_v52 }
 0x2d8   :  { %v655_v36 = vpack.c.bf16 %v640_v32, %v639_v31 }
 0x2da   :  { %v1381_v0 = vpop.f32.mrb[20].mxu0  ;;  %1407 = vmatprep.mubr.bf16.mxu1 %v655_v36 }
 0x2db   :  { %v592_v42 = vpop.f32.mrb[21].mxu0  ;;  %1408 = vmatmul.mubr.bf16.vlgmr.msra.gmra.mrb[16].mxu1 %v656_v34  ;;  %v645_v37 = vadd.f32 %v1381_v0, %v524_v59 }
 0x2dc   :  { %v1382_v1 = vpop.f32.mrb[22].mxu0  ;;  %v643_v33 = vadd.f32 %v592_v42, %v522_v56 }
 0x2dd   :  { %v646_v35 = vadd.f32 %v1382_v1, %v525_v57  ;;  %v595_v2 = vpop.f32.mrb[23].mxu0 }
 0x2de   :  { %v644_v38 = vadd.f32 %v595_v2, %v523_v58 }
 0x2df   :  { %v658_v39 = vpack.c.bf16 %v646_v35, %v645_v37 }
 0x2e0   :  { %v657_v41 = vpack.c.bf16 %v644_v38, %v643_v33 }
 0x2e2   :  { %v1385_v5 = vpop.f32.mrb[24].mxu0  ;;  %1411 = vmatprep.mubr.bf16.mxu1 %v657_v41 }
 0x2e3   :  { %v608_v44 = vpop.f32.mrb[25].mxu0  ;;  %1412 = vmatmul.mubr.bf16.gmra.mrb[20].mxu1 %v658_v39  ;;  %v649_v49 = vadd.f32 %v1385_v5, %v528_v13 }
 0x2e4   :  { %v1386_v46 = vpop.f32.mrb[26].mxu0  ;;  %v647_v45 = vadd.f32 %v608_v44, %v526_v6 }
 0x2e5   :  { %v650_v47 = vadd.f32 %v1386_v46, %v529_v10  ;;  %v611_v50 = vpop.f32.mrb[27].mxu0 }
 0x2e6   :  { %v648_v55 = vadd.f32 %v611_v50, %v527_v12 }
 0x2e7   :  { %v660_v56 = vpack.c.bf16 %v650_v47, %v649_v49 }
 0x2e8   :  { %v659_v57 = vpack.c.bf16 %v648_v55, %v647_v45 }
 0x2ea   :  { %v1389_v58 = vpop.f32.mrb[28].mxu0  ;;  %1415 = vmatprep.mubr.bf16.mxu1 %v659_v57 }
 0x2eb   :  { %v624_v59 = vpop.f32.mrb[29].mxu0  ;;  %1416 = vmatmul.mubr.bf16.gmra.mrb[24].mxu1 %v660_v56  ;;  %v653_v60 = vadd.f32 %v1389_v58, %v532_v25 }
 0x2ec   :  { %v1390_v9 = vpop.f32.mrb[30].mxu0  ;;  %v651_v61 = vadd.f32 %v624_v59, %v530_v26 }
 0x2ed   :  { %v654_v11 = vadd.f32 %v1390_v9, %v533_v27  ;;  %v627_v7 = vpop.f32.mrb[31].mxu0 }
 0x2ee   :  { %v652_v8 = vadd.f32 %v627_v7, %v531_v24 }
 0x2ef   :  { %v662_v62 = vpack.c.bf16 %v654_v11, %v653_v60 }
 0x2f0   :  { %v661_v63 = vpack.c.bf16 %v652_v8, %v651_v61 }
 0x2f2   :  { %1419 = vmatprep.mubr.bf16.mxu1 %v661_v63 }
 0x2f3   :  { %1420 = vmatmul.mubr.bf16.gmra.mrb[28].mxu1 %v662_v62 }
 0x3ae   :  { %v1409_v4 = vpop.f32.mrb[16].mxu1 }
 0x3af   :  { %v777_v6 = vadd.f32 %v1409_v4, %v1874_v3  ;;  %v768_v10 = vpop.f32.mrb[17].mxu1 }
 0x3b0   :  { %v769_v12 = vadd.f32 %v1874_v3, %v768_v10  ;;  %v1410_v13 = vpop.f32.mrb[18].mxu1 }
 0x3b1   :  { %v780_v16 = vadd.f32 %v1410_v13, %v1874_v3  ;;  %v771_v17 = vpop.f32.mrb[19].mxu1  ;;  %v833_v20 = vmax.f32 %v777_v6, 0.0 }
 0x3b2   :  { %v831_v18 = vmax.f32 %v769_v12, 0.0  ;;  %v772_v19 = vadd.f32 %v1874_v3, %v771_v17 }
 0x3b3   :  { %v834_v14 = vmax.f32 %v780_v16, 0.0 }
 0x3b4   :  { %v832_v15 = vmax.f32 %v772_v19, 0.0  ;;  %927 = vxpose.xlu0.b32.start [1/16] %v831_v18, 128 }
 0x3b5   :  { %v1145_v21 = vpack.c.bf16 %v834_v14, %v833_v20 }
 0x3b6   :  { %v1140_v22 = vpack.c.bf16 %v832_v15, %v831_v18  ;;  %v1413_v23 = vpop.f32.mrb[20].mxu1 }
 0x3b7   :  { %1217 = vst [vmem:[%s1947_s7 + $0x8] sm:$0xff] %v1145_v21   ;;  %v793_v26 = vadd.f32 %v1413_v23, %v1874_v3  ;;  %v784_v27 = vpop.f32.mrb[21].mxu1 }
 0x3b8   :  { %1141 = vst [vmem:[%s1947_s7] sm:$0xff] %v1140_v22   ;;  %v785_v24 = vadd.f32 %v1874_v3, %v784_v27  ;;  %928 = vxpose.xlu0.b32.cont [2/16] %v832_v15, 128  ;;  %v1414_v25 = vpop.f32.mrb[22].mxu1 }
 0x3b9   :  { %v796_v29 = vadd.f32 %v1414_v25, %v1874_v3  ;;  %v787_v30 = vpop.f32.mrb[23].mxu1  ;;  %v837_v40 = vmax.f32 %v793_v26, 0.0 }
 0x3ba   :  { %v788_v28 = vadd.f32 %v1874_v3, %v787_v30  ;;  %v835_v48 = vmax.f32 %v785_v24, 0.0 }
 0x3bb   :  { %v838_v43 = vmax.f32 %v796_v29, 0.0 }
 0x3bc   :  { %v836_v51 = vmax.f32 %v788_v28, 0.0  ;;  %929 = vxpose.xlu0.b32.cont [3/16] %v833_v20, 128 }
 0x3bd   :  { %v1155_v52 = vpack.c.bf16 %v838_v43, %v837_v40 }
 0x3be   :  { %v1150_v53 = vpack.c.bf16 %v836_v51, %v835_v48  ;;  %v1417_v54 = vpop.f32.mrb[24].mxu1 }
 0x3bf   :  { %1219 = vst [vmem:[%s1947_s7 + $0x18] sm:$0xff] %v1155_v52   ;;  %v809_v31 = vadd.f32 %v1417_v54, %v1874_v3  ;;  %v800_v32 = vpop.f32.mrb[25].mxu1 }
 0x3c0   :  { %1218 = vst [vmem:[%s1947_s7 + $0x10] sm:$0xff] %v1150_v53   ;;  %v801_v34 = vadd.f32 %v1874_v3, %v800_v32  ;;  %930 = vxpose.xlu0.b32.cont [4/16] %v834_v14, 128  ;;  %v1418_v36 = vpop.f32.mrb[26].mxu1 }
 0x3c1   :  { %v812_v0 = vadd.f32 %v1418_v36, %v1874_v3  ;;  %v803_v42 = vpop.f32.mrb[27].mxu1  ;;  %v841_v37 = vmax.f32 %v809_v31, 0.0 }
 0x3c2   :  { %v804_v1 = vadd.f32 %v1874_v3, %v803_v42  ;;  %v839_v2 = vmax.f32 %v801_v34, 0.0 }
 0x3c3   :  { %v842_v35 = vmax.f32 %v812_v0, 0.0 }
 0x3c4   :  { %v840_v33 = vmax.f32 %v804_v1, 0.0  ;;  %931 = vxpose.xlu0.b32.cont [5/16] %v835_v48, 128 }
 0x3c5   :  { %v1165_v38 = vpack.c.bf16 %v842_v35, %v841_v37 }
 0x3c6   :  { %v1160_v39 = vpack.c.bf16 %v840_v33, %v839_v2  ;;  %v1421_v41 = vpop.f32.mrb[28].mxu1 }
 0x3c7   :  { %1221 = vst [vmem:[%s1947_s7 + $0x28] sm:$0xff] %v1165_v38   ;;  %v825_v5 = vadd.f32 %v1421_v41, %v1874_v3  ;;  %v816_v44 = vpop.f32.mrb[29].mxu1 }
 0x3c8   :  { %1220 = vst [vmem:[%s1947_s7 + $0x20] sm:$0xff] %v1160_v39   ;;  %v817_v46 = vadd.f32 %v1874_v3, %v816_v44  ;;  %932 = vxpose.xlu0.b32.cont [6/16] %v836_v51, 128  ;;  %v1422_v49 = vpop.f32.mrb[30].mxu1 }
 0x3c9   :  { %v828_v47 = vadd.f32 %v1422_v49, %v1874_v3  ;;  %v819_v50 = vpop.f32.mrb[31].mxu1  ;;  %v845_v55 = vmax.f32 %v825_v5, 0.0 }
 0x3ca   :  { %v820_v45 = vadd.f32 %v1874_v3, %v819_v50  ;;  %v843_v57 = vmax.f32 %v817_v46, 0.0 }
 0x3cb   :  { %v846_v56 = vmax.f32 %v828_v47, 0.0 }
 0x3cc   :  { %v844_v58 = vmax.f32 %v820_v45, 0.0  ;;  %933 = vxpose.xlu0.b32.cont [7/16] %v837_v40, 128 }
 0x3cd   :  { %v1175_v59 = vpack.c.bf16 %v846_v56, %v845_v55 }
 0x3ce   :  { %v1170_v9 = vpack.c.bf16 %v844_v58, %v843_v57 }
 0x3cf   :  { %1223 = vst [vmem:[%s1947_s7 + $0x38] sm:$0xff] %v1175_v59  }
 0x3d0   :  { %1222 = vst [vmem:[%s1947_s7 + $0x30] sm:$0xff] %v1170_v9   ;;  %934 = vxpose.xlu0.b32.cont [8/16] %v838_v43, 128 }
 0x3d4   :  { %935 = vxpose.xlu0.b32.cont [9/16] %v839_v2, 128 }
 0x3d8   :  { %936 = vxpose.xlu0.b32.cont [10/16] %v840_v33, 128 }
 0x3dc   :  { %937 = vxpose.xlu0.b32.cont [11/16] %v841_v37, 128 }
 0x3e0   :  { %938 = vxpose.xlu0.b32.cont [12/16] %v842_v35, 128 }
 0x3e4   :  { %939 = vxpose.xlu0.b32.cont [13/16] %v843_v57, 128 }
 0x3e8   :  { %940 = vxpose.xlu0.b32.cont [14/16] %v844_v58, 128 }
 0x3ec   :  { %941 = vxpose.xlu0.b32.cont [15/16] %v845_v55, 128 }
 0x3f0   :  { %942 = vxpose.xlu0.b32.end [16/16] %v846_v56, 128 }
 0x434   :  { %v943_v60 = vpop.trf.xlu0 }
 0x438   :  { %v944_v11 = vpop.trf.xlu0 }
 0x439   :  { %v1180_v7 = vpack.c.bf16 %v944_v11, %v943_v60 }
 0x43b   :  { %1181 = vst [vmem:[%s1948_s8] sm:$0xff] %v1180_v7  }
 0x43c   :  { %v945_v61 = vpop.trf.xlu0 }
 0x440   :  { %v946_v8 = vpop.trf.xlu0 }
 0x441   :  { %v1185_v62 = vpack.c.bf16 %v946_v8, %v945_v61 }
 0x443   :  { %1224 = vst [vmem:[%s1948_s8 + $0x8] sm:$0xff] %v1185_v62  }
 0x444   :  { %v947_v63 = vpop.trf.xlu0 }
 0x448   :  { %v948_v3 = vpop.trf.xlu0 }
 0x449   :  { %v1190_v4 = vpack.c.bf16 %v948_v3, %v947_v63 }
 0x44b   :  { %1225 = vst [vmem:[%s1948_s8 + $0x10] sm:$0xff] %v1190_v4  }
 0x44c   :  { %v949_v6 = vpop.trf.xlu0 }
 0x450   :  { %v950_v10 = vpop.trf.xlu0 }
 0x451   :  { %v1195_v12 = vpack.c.bf16 %v950_v10, %v949_v6 }
 0x453   :  { %1226 = vst [vmem:[%s1948_s8 + $0x18] sm:$0xff] %v1195_v12  }
 0x454   :  { %v951_v13 = vpop.trf.xlu0 }
 0x458   :  { %v952_v16 = vpop.trf.xlu0 }
 0x459   :  { %v1200_v17 = vpack.c.bf16 %v952_v16, %v951_v13 }
 0x45b   :  { %1227 = vst [vmem:[%s1948_s8 + $0x20] sm:$0xff] %v1200_v17  }
 0x45c   :  { %v953_v18 = vpop.trf.xlu0 }
 0x460   :  { %v954_v19 = vpop.trf.xlu0 }
 0x461   :  { %v1205_v20 = vpack.c.bf16 %v954_v19, %v953_v18 }
 0x463   :  { %1228 = vst [vmem:[%s1948_s8 + $0x28] sm:$0xff] %v1205_v20  }
 0x464   :  { %v955_v14 = vpop.trf.xlu0 }
 0x468   :  { %v956_v15 = vpop.trf.xlu0 }
 0x469   :  { %v1210_v21 = vpack.c.bf16 %v956_v15, %v955_v14 }
 0x46b   :  { %1229 = vst [vmem:[%s1948_s8 + $0x30] sm:$0xff] %v1210_v21  }
 0x46c   :  { %v957_v22 = vpop.trf.xlu0 }
 0x470   :  { %v958_v23 = vpop.trf.xlu0 }
 0x471   :  { %v1215_v26 = vpack.c.bf16 %v958_v23, %v957_v22 }
 0x473   :  { %1230 = vst [vmem:[%s1948_s8 + $0x38] sm:$0xff] %v1215_v26  }

</bundles_post_ra>
